<compile_context>
chip_gen: v7x
topology: tpu7x:2x2x1
jax: 0.10.0
libtpu: 0.0.40
codegen_flags: <defaults>
</compile_context>

<pallas_src>
import numpy as np
import jax
import jax.numpy as jnp
from jax.experimental import pallas as pl
from jax.experimental.pallas import tpu as pltpu


def _round_up(v, m):
    return ((v + m - 1) // m) * m


def build_system_robots(xbar, is_linear, k=1.0):
    """Returns (pallas_forward, jax_reference, num_states, num_inputs)."""
    xbar_np = np.asarray(xbar, np.float32).reshape(-1)
    n_agents = xbar_np.shape[0] // 4
    ns = 4 * n_agents          # num_states
    ni = 2 * n_agents          # num_inputs
    h = 0.05
    mass = 1.0
    b = 1.0
    b2 = None if is_linear else 0.1

    # ---- deterministic parameter construction (matches torch __init__) ----
    Bblk = np.array([[0.0, 0.0],
                     [0.0, 0.0],
                     [1.0 / mass, 0.0],
                     [0.0, 1.0 / mass]], np.float32)
    Bmat = (np.kron(np.eye(n_agents, dtype=np.float32), Bblk) * h).astype(np.float32)

    A2blk = np.block([
        [np.zeros((2, 2)), np.eye(2)],
        [np.diag([-k / mass, -k / mass]), np.diag([-b / mass, -b / mass])],
    ]).astype(np.float32)
    A2 = np.kron(np.eye(n_agents, dtype=np.float32), A2blk).astype(np.float32)
    Amat = (np.eye(ns, dtype=np.float32) + h * A2).astype(np.float32)

    # ---- fused, pre-transposed, lane-dense (padded) constants --------------
    width = 2 * ns + ni                      # columns of [x | u | w]
    P = _round_up(max(width, ns), 128)       # lane-dense feature width

    M_np = np.zeros((P, P), np.float32)
    M_np[:ns, :ns] = Amat.T                                     # x @ A^T
    M_np[ns:ns + ni, :ns] = Bmat.T                              # u @ B^T
    M_np[ns + ni:width, :ns] = np.eye(ns, dtype=np.float32)     # + w

    bias_np = np.zeros((1, P), np.float32)
    bias_np[0, :ns] = xbar_np - xbar_np @ Amat.T                # xbar - xbar @ A^T

    xbar_pad_np = np.zeros((1, P), np.float32)
    xbar_pad_np[0, :ns] = xbar_np

    vmask_np = np.zeros((1, P), np.float32)                     # 1 at velocity coords
    for a in range(n_agents):
        vmask_np[0, 4 * a + 2] = 1.0
        vmask_np[0, 4 * a + 3] = 1.0

    Mmat = jnp.asarray(M_np)
    bias = jnp.asarray(bias_np)
    xbar_pad = jnp.asarray(xbar_pad_np)
    vmask = jnp.asarray(vmask_np)
    Amat_j = jnp.asarray(Amat)
    Bmat_j = jnp.asarray(Bmat)
    xbar2d = jnp.asarray(xbar_np.reshape(1, ns))

    # ---------------------------- Pallas kernels ----------------------------
    def kernel_linear(xuw_ref, m_ref, bias_ref, out_ref):
        out_ref[...] = (
            jnp.dot(xuw_ref[...], m_ref[...], preferred_element_type=jnp.float32)
            + bias_ref[...])

    def kernel_nonlinear(xuw_ref, m_ref, bias_ref, xbar_ref, vmask_ref, out_ref):
        xuw = xuw_ref[...]                                   # (TB, P)
        f = jnp.dot(xuw, m_ref[...], preferred_element_type=jnp.float32)
        f = f + bias_ref[...]
        vm = vmask_ref[...]                                  # (1, P)
        sq = (xuw * xuw) * vm                                # v^2 at velocity lanes
        # same-agent vx^2 + vy^2: velocity lanes are adjacent -> +/-1 lane sums (XLU)
        nb = pltpu.roll(sq, shift=1, axis=1) + pltpu.roll(sq, shift=P - 1, axis=1)
        speed_sq = (sq + nb) * vm
        diag = (-b2 / mass) * jnp.sqrt(speed_sq)             # 0 outside velocity lanes
        f = f + h * ((xuw - xbar_ref[...]) * diag)           # bmm with diagonal matrix
        out_ref[...] = f

    # ------------------------------- wrapper ---------------------------------
    def forward(t, x, u, w):
        """x, w: (batch, 1, ns); u: (batch, 1, ni)."""
        del t  # unused, as in the PyTorch module
        x2 = x.reshape(-1, ns).astype(jnp.float32)
        u2 = u.reshape(-1, ni).astype(jnp.float32)
        w2 = w.reshape(-1, ns).astype(jnp.float32)
        batch = x2.shape[0]

        # batch tile: multiple of 8, capped so double-buffered tiles fit VMEM
        vmem_cap_rows = max(8, ((20 * 1024 * 1024) // (16 * P)) // 8 * 8)
        TB = max(8, min(1024, _round_up(batch, 8), vmem_cap_rows))
        B_pad = _round_up(batch, TB)

        xuw = jnp.concatenate([x2, u2, w2], axis=1)          # (batch, 2ns+ni)
        xuw = jnp.pad(xuw, ((0, B_pad - batch), (0, P - width)))

        tile_spec = pl.BlockSpec((TB, P), lambda i: (i, 0))
        const2d = pl.BlockSpec((P, P), lambda i: (0, 0))
        const_row = pl.BlockSpec((1, P), lambda i: (0, 0))

        if is_linear:
            kern = kernel_linear
            in_specs = [tile_spec, const2d, const_row]
            args = (xuw, Mmat, bias)
            transcendentals = 0
        else:
            kern = kernel_nonlinear
            in_specs = [tile_spec, const2d, const_row, const_row, const_row]
            args = (xuw, Mmat, bias, xbar_pad, vmask)
            transcendentals = B_pad * P

        cost = pl.CostEstimate(
            flops=2 * B_pad * P * P + 8 * B_pad * P,
            transcendentals=transcendentals,
            bytes_accessed=4 * (2 * B_pad * P + P * P + 4 * P))

        out = pl.pallas_call(
            kern,
            out_shape=jax.ShapeDtypeStruct((B_pad, P), jnp.float32),
            grid=(B_pad // TB,),
            in_specs=in_specs,
            out_specs=pl.BlockSpec((TB, P), lambda i: (i, 0)),
            compiler_params=pltpu.CompilerParams(
                dimension_semantics=("parallel",),
                vmem_limit_bytes=32 * 1024 * 1024),
            cost_estimate=cost,
        )(*args)

        x_ = out[:batch, :ns].reshape(batch, 1, ns)
        y = x_
        return x_, y

    # ----------------- pure-JAX reference (for verification) ----------------
    def reference(t, x, u, w):
        del t
        x2 = x.reshape(-1, ns).astype(jnp.float32)
        u2 = u.reshape(-1, ni).astype(jnp.float32)
        w2 = w.reshape(-1, ns).astype(jnp.float32)
        dx = x2 - xbar2d
        if is_linear:
            f = dx @ Amat_j.T + u2 @ Bmat_j.T + xbar2d
        else:
            msk = jnp.tile(jnp.array([[0.0, 0.0], [1.0, 1.0]], jnp.float32),
                           (n_agents, 1))
            A3 = jnp.linalg.norm(x2.reshape(-1, 2 * n_agents, 2) * msk,
                                 axis=-1, keepdims=True)
            A3 = jnp.kron(A3, jnp.ones((2, 1), jnp.float32))
            diag = -b2 / mass * A3[..., 0]                      # (batch, ns)
            Anl = Amat_j[None] + h * jax.vmap(jnp.diag)(diag)   # (batch, ns, ns)
            f = jnp.einsum('bj,bij->bi', dx, Anl) + u2 @ Bmat_j.T + xbar2d
        out = f + w2
        return out.reshape(-1, 1, ns), out.reshape(-1, 1, ns)

    return forward, reference, ns, ni


# TODO(synk): rollout() needs an external `controller` module and a Python time
# loop; it is orchestration glue, not kernel compute, and is not ported. (If it
# were, the right move per the review is a single pallas_call with a time grid
# axis marked "arbitrary" to amortize launch overhead across timesteps.)

if __name__ == "__main__":
    n_agents = 2
    ns = 4 * n_agents
    ni = 2 * n_agents

    # deterministic target: two agents at (+2,+2) and (-2,-2), zero velocity
    xbar = jnp.array([2.0, 2.0, 0.0, 0.0, -2.0, -2.0, 0.0, 0.0], jnp.float32)

    key = jax.random.PRNGKey(0)

    # batch=2: single-tile grid; batch=1536: multi-tile pipelined grid + row padding
    for batch in (2, 1536):
        kx, ku, kw = jax.random.split(jax.random.fold_in(key, batch), 3)
        x = jax.random.normal(kx, (batch, 1, ns), jnp.float32)
        u = jax.random.normal(ku, (batch, 1, ni), jnp.float32)
        w = 0.1 * jax.random.normal(kw, (batch, 1, ns), jnp.float32)

        for is_linear in (True, False):
            fwd, ref, _, _ = build_system_robots(xbar, is_linear, k=1.0)
            x_, y = fwd(0, x, u, w)
            jax.block_until_ready(x_)
            x_ref, _ = ref(0, x, u, w)
            assert x_.shape == (batch, 1, ns)
            assert y.shape == (batch, 1, ns)
            np.testing.assert_allclose(np.asarray(x_), np.asarray(x_ref),
                                       rtol=1e-5, atol=1e-5)

    print("KERNEL_OK")
</pallas_src>

<mosaic_0001>
module attributes {stable_mosaic.version = 11 : i64} {
  func.func @kernel_linear(%arg0: i32, %arg1: memref<8x128xf32, #tpu.memory_space<vmem>>, %arg2: memref<128x128xf32, #tpu.memory_space<vmem>>, %arg3: memref<1x128xf32, #tpu.memory_space<vmem>>, %arg4: memref<8x128xf32, #tpu.memory_space<vmem>>) attributes {dimension_semantics = [#tpu.dimension_semantics<parallel>], iteration_bounds = array<i64: 1>, scalar_prefetch = 0 : i64, scratch_operands = 0 : i64, tpu.core_type = #tpu.core_type<tc>, window_params = [{transform_indices = @transform_0, window_bounds = array<i64: 8, 128>}, {pipeline_mode = #tpu.pipeline_mode<synchronous>, transform_indices = @transform_1, window_bounds = array<i64: 128, 128>}, {pipeline_mode = #tpu.pipeline_mode<synchronous>, transform_indices = @transform_2, window_bounds = array<i64: 1, 128>}, {transform_indices = @transform_3, window_bounds = array<i64: 8, 128>}]} {
    %c0 = arith.constant 0 : index
    %c0_0 = arith.constant 0 : index
    %0 = vector.load %arg1[%c0, %c0_0] : memref<8x128xf32, #tpu.memory_space<vmem>>, vector<8x128xf32>
    %c0_1 = arith.constant 0 : index
    %c0_2 = arith.constant 0 : index
    %1 = vector.load %arg2[%c0_1, %c0_2] : memref<128x128xf32, #tpu.memory_space<vmem>>, vector<128x128xf32>
    %cst = arith.constant dense<0.000000e+00> : vector<8x128xf32>
    %2 = tpu.matmul %0, %1, %cst {dimension_numbers = #tpu.dot_dimension_numbers<[1], [0], [0], [1], [0, 0, 1, 1], [], []>} : vector<8x128xf32>, vector<128x128xf32>, vector<8x128xf32> -> vector<8x128xf32>
    %c0_3 = arith.constant 0 : index
    %c0_4 = arith.constant 0 : index
    %3 = vector.load %arg3[%c0_3, %c0_4] : memref<1x128xf32, #tpu.memory_space<vmem>>, vector<1x128xf32>
    %4 = vector.broadcast %3 : vector<1x128xf32> to vector<8x128xf32>
    %5 = arith.addf %2, %4 : vector<8x128xf32>
    %c0_5 = arith.constant 0 : index
    %c0_6 = arith.constant 0 : index
    %6 = vector.load %arg4[%c0_5, %c0_6] : memref<8x128xf32, #tpu.memory_space<vmem>>, vector<8x128xf32>
    tpu.vector_store %arg4[%c0_5, %c0_6], %5 {strides = array<i32>} : memref<8x128xf32, #tpu.memory_space<vmem>>, vector<8x128xf32>,
    return
  }
  func.func @transform_0(%arg0: i32) -> (i32, i32) {
    %c0_i32 = arith.constant 0 : i32
    %c0_i32_0 = arith.constant 0 : i32
    return %arg0, %c0_i32 : i32, i32
  }
  func.func @transform_1(%arg0: i32) -> (i32, i32) {
    %c0_i32 = arith.constant 0 : i32
    %c0_i32_0 = arith.constant 0 : i32
    %c0_i32_1 = arith.constant 0 : i32
    return %c0_i32, %c0_i32_0 : i32, i32
  }
  func.func @transform_2(%arg0: i32) -> (i32, i32) {
    %c0_i32 = arith.constant 0 : i32
    %c0_i32_0 = arith.constant 0 : i32
    %c0_i32_1 = arith.constant 0 : i32
    return %c0_i32, %c0_i32_0 : i32, i32
  }
  func.func @transform_3(%arg0: i32) -> (i32, i32) {
    %c0_i32 = arith.constant 0 : i32
    %c0_i32_0 = arith.constant 0 : i32
    return %arg0, %c0_i32 : i32, i32
  }
}

</mosaic_0001>

<bundles_post_ra>
// kernel: tpu_custom_call.1
= control target key start
LH: loop header
LB: loop body
LE: loop exit
PB: predicated region body
PF: predicated region fallthrough
CT: control target
= control target key end

     0   :  { %8 = vsyncpa [#allocation3], 0  ;;  %s383_s0 = inlined_call_operand.hbm [shape: f32[8,128], index: 0, kind: input, shape index: {}]   ;;  %s384_s1 = inlined_call_operand.hbm [shape: f32[128,128], index: 1, kind: input, shape index: {}]   ;;  %s385_s2 = inlined_call_operand.vmem [shape: f32[1,128], index: 2, kind: input, shape index: {}]   ;;  %s386_s3 = inlined_call_operand.hbm [shape: f32[8,128], index: 3, kind: output, shape index: {}]  }
   0x1   :  { %9 = vsyncpa [#allocation6], 0 }
   0x2   :  { %10 = vsyncpa [#allocation4], 0  ;;  %s309_s12 = smov [#allocation2]   ;;  %s310_s14 = smov [#allocation5]  }
   0x3   :  { %s17_s13 = sshll.u32 %s309_s12, 4  ;;  %s26_s15 = sshll.u32 %s310_s14, 4  ;;  %s18_s13 = int_to_ptr.vmem [resolvable:$true] %s17_s13  ;;  %s337_s15 = int_to_ptr.vmem [resolvable:$true] %s26_s15 }
   0x4   :  { %s237_s18 = scalar_lea.hbm %s383_s0, 128 }
   0x5   :  { %p238_p0 = scmp.ne.s32.totalorder %s383_s0, %s237_s18  ;;  %p241_p1 = scmp.lt.u32.totalorder %s237_s18, %s383_s0 }
   0x7   :  { %p243_p2 = pnand %p241_p1, %p238_p0 }
   0x9   :  { %246 = shalt.err (!%p243_p2)
}
   0xa   :  { %s247_s23 = scalar_lea.vmem %s18_s13, 128  ;;  %p252_p4 = scmp.lt.s32.totalorder %s18_s13, %s18_s13 }
   0xb   :  { %p248_p3 = scmp.ne.s32.totalorder %s18_s13, %s247_s23  ;;  %p253_p5 = scmp.lt.s32.totalorder %s247_s23, %s247_s23 }
   0xd   :  { %p254_p6 = por %p253_p5, %p252_p4 }
   0xf   :  { %p255_p7 = pnand %p254_p6, %p248_p3 }
  0x11   :  { %258 = shalt.err (!%p255_p7)
}
  0x12   :  { %20 = dma.hbm_to_vmem [thread:$0]  %s383_s0, 128, %s18_s13, [#allocation3]  }
  0x13   :  { %s259_s28 = scalar_lea.hbm %s384_s1, 2048 }
  0x14   :  { %p260_p8 = scmp.ne.s32.totalorder %s384_s1, %s259_s28  ;;  %p263_p9 = scmp.lt.u32.totalorder %s259_s28, %s384_s1 }
  0x16   :  { %p265_p10 = pnand %p263_p9, %p260_p8 }
  0x18   :  { %268 = shalt.err (!%p265_p10)
}
  0x19   :  { %s269_s6 = scalar_lea.vmem %s337_s15, 2048  ;;  %p274_p12 = scmp.lt.s32.totalorder %s337_s15, %s337_s15 }
  0x1a   :  { %p270_p11 = scmp.ne.s32.totalorder %s337_s15, %s269_s6  ;;  %p275_p13 = scmp.lt.s32.totalorder %s269_s6, %s269_s6 }
  0x1c   :  { %p276_p0 = por %p275_p13, %p274_p12 }
  0x1e   :  { %p277_p1 = pnand %p276_p0, %p270_p11 }
  0x20   :  { %280 = shalt.err (!%p277_p1)
}
  0x21   :  { %s311_s0 = smov 128   ;;  %s312_s7 = smov 8  }
  0x22   :  { %32 = dma.hbm_to_vmem [thread:$0]  %s384_s1, 2048, %s337_s15, [#allocation6], %s311_s0, %s311_s0, %s312_s7  }
  0x23   :  { %303 = dma.done.wait [#allocation3], 128  }
  0x24   :  { %304 = vsyncadd [#allocation3], 4294967168 }
  0x25   :  { %305 = dma.done.wait [#allocation6], 2048  }
  0x26   :  { %306 = vsyncadd [#allocation6], 4294965248  ;;  %v313_v0 = vmov 0.0|0.0   ;;  %vm314_vm0 = vmmov 0   ;;  %v315_v1 = vmov 0.0   ;;  %v42_v2 = vld [vmem:[#allocation5] sm:$0xff] }
  0x27   :  { %205 = vmatprep.subr.bf16.mxu0 %v313_v0  ;;  %202 = vmatprep.mubr.msk.f32.mxu0 %vm314_vm0, %v315_v1  ;;  %v43_v3 = vld [vmem:[#allocation5 + $0x8] sm:$0xff]  ;;  %v44_v4 = vld [vmem:[#allocation5 + $0x10] sm:$0xff]  ;;  %v45_v6 = vld [vmem:[#allocation5 + $0x18] sm:$0xff]  ;;  %s316_s11 = smov [#allocation7]  }
  0x28   :  { %v206_v5 = vpack.c.bf16 %v43_v3, %v42_v2  ;;  %v209_v7 = vpack.c.bf16 %v45_v6, %v44_v4  ;;  %v46_v8 = vld [vmem:[#allocation5 + $0x20] sm:$0xff]  ;;  %v47_v9 = vld [vmem:[#allocation5 + $0x28] sm:$0xff]  ;;  %v48_v11 = vld [vmem:[#allocation5 + $0x30] sm:$0xff]  ;;  %s142_s12 = sshll.u32 %s316_s11, 4  ;;  %s143_s12 = int_to_ptr.vmem [resolvable:$true] %s142_s12 }
  0x29   :  { %v212_v10 = vpack.c.bf16 %v47_v9, %v46_v8  ;;  %v49_v12 = vld [vmem:[#allocation5 + $0x38] sm:$0xff]  ;;  %v50_v14 = vld [vmem:[#allocation5 + $0x40] sm:$0xff]  ;;  %v51_v15 = vld [vmem:[#allocation5 + $0x48] sm:$0xff]  ;;  %s281_s13 = scalar_lea.vmem %s143_s12, 128  ;;  %p286_p3 = scmp.lt.s32.totalorder %s143_s12, %s143_s12 }
  0x2a   :  { %207 = vmatpush3.bf16.msra.mxu0 %v206_v5  ;;  %v215_v13 = vpack.c.bf16 %v49_v12, %v48_v11  ;;  %v218_v16 = vpack.c.bf16 %v51_v15, %v50_v14  ;;  %v52_v17 = vld [vmem:[#allocation5 + $0x50] sm:$0xff]  ;;  %v53_v18 = vld [vmem:[#allocation5 + $0x58] sm:$0xff]  ;;  %v54_v20 = vld [vmem:[#allocation5 + $0x60] sm:$0xff]  ;;  %p282_p2 = scmp.ne.s32.totalorder %s143_s12, %s281_s13  ;;  %p287_p4 = scmp.lt.s32.totalorder %s281_s13, %s281_s13 }
  0x2b   :  { %208 = vmatprep.subr.bf16.mxu0 %v313_v0  ;;  %v221_v19 = vpack.c.bf16 %v53_v18, %v52_v17  ;;  %v55_v21 = vld [vmem:[#allocation5 + $0x68] sm:$0xff]  ;;  %v56_v23 = vld [vmem:[#allocation5 + $0x70] sm:$0xff]  ;;  %v57_v24 = vld [vmem:[#allocation5 + $0x78] sm:$0xff] }
  0x2c   :  { %v224_v22 = vpack.c.bf16 %v55_v21, %v54_v20  ;;  %v227_v25 = vpack.c.bf16 %v57_v24, %v56_v23  ;;  %v41_v26 = vld [vmem:[#allocation2] sm:$0xff]  ;;  %p288_p5 = por %p287_p4, %p286_p3 }
  0x2d   :  { %v152_v27 = vld [vmem:[%s385_s2] ss:$0 sm:$0xff] }
  0x2e   :  { %210 = vmatpush3.bf16.msra.mxu0 %v209_v7  ;;  %p289_p6 = pnand %p288_p5, %p282_p2 }
  0x2f   :  { %211 = vmatprep.subr.bf16.mxu0 %v313_v0 }
  0x32   :  { %213 = vmatpush3.bf16.msra.mxu0 %v212_v10 }
  0x33   :  { %214 = vmatprep.subr.bf16.mxu0 %v313_v0 }
  0x36   :  { %216 = vmatpush3.bf16.msra.mxu0 %v215_v13 }
  0x37   :  { %217 = vmatprep.subr.bf16.mxu0 %v313_v0 }
  0x3a   :  { %219 = vmatpush3.bf16.msra.mxu0 %v218_v16 }
  0x3b   :  { %220 = vmatprep.subr.bf16.mxu0 %v313_v0 }
  0x3e   :  { %222 = vmatpush3.bf16.msra.mxu0 %v221_v19 }
  0x3f   :  { %223 = vmatprep.subr.bf16.mxu0 %v313_v0 }
  0x42   :  { %225 = vmatpush3.bf16.msra.mxu0 %v224_v22 }
  0x43   :  { %226 = vmatprep.subr.bf16.mxu0 %v313_v0 }
  0x46   :  { %228 = vmatpush3.bf16.msra.mxu0 %v227_v25 }
  0x49   :  { %203 = vmatmul.mubr.f32.vlgmr.msra.gmra.mrb[0].mxu0 %v41_v26 }
 0x11c   :  { %v131_v28 = vpop.f32.mrb[0].mxu0 }
 0x11d   :  { %v132_v29 = vadd.f32 %v152_v27, %v131_v28  ;;  %v204_v30 = vpop.f32.mrb[1].mxu0 }
 0x11f   :  { %135 = vst [vmem:[#allocation7] sm:$0xff] %v132_v29 }
 0x120   :  { %292 = shalt.err (!%p289_p6)
}
 0x121   :  { %s293_s16 = scalar_lea.hbm %s386_s3, 128 }
 0x122   :  { %p294_p7 = scmp.ne.s32.totalorder %s386_s3, %s293_s16  ;;  %p297_p8 = scmp.lt.u32.totalorder %s293_s16, %s386_s3 }
 0x124   :  { %p299_p9 = pnand %p297_p8, %p294_p7 }
 0x126   :  { %302 = shalt.err (!%p299_p9)
}
 0x127   :  { %145 = dma.vmem_to_hbm [thread:$0]  %s143_s12, 128, %s386_s3, [#allocation4]  }
 0x128   :  { %307 = dma.done.wait [#allocation4], 128  }
 0x129   :  { %308 = vsyncadd [#allocation4], 4294967168 }
 0x12a   :  { %149 = vsyncpa [#allocation3], 1 }
 0x12b   :  { %150 = vsyncpa [#allocation6], 1 }
 0x12c   :  { %151 = vsyncpa [#allocation4], 1 }

</bundles_post_ra>
